<compile_context>
chip_gen: v6e
topology: v6e:2x2x1
jax: 0.10.0
libtpu: 0.0.40
codegen_flags: <defaults>
</compile_context>

<pallas_src>
import functools

import jax
import jax.numpy as jnp
from jax import lax
from jax.experimental import pallas as pl
from jax.experimental.pallas import tpu as pltpu


def _round_up(x, m):
    return ((x + m - 1) // m) * m


def _xattn_kernel(temp_ref,            # SMEM (1,) f32 — raw temperature
                  q_ref,               # VMEM [TQ, Dq]  query-side feature tile
                  k_ref,               # VMEM [Nk, Dk]  key-side features (resident)
                  wq_ref,              # VMEM [Dq, R]   query rank projection
                  wkv_ref,             # VMEM [Dk, 2R]  fused key|value rank projection
                  wout_ref,            # VMEM [R, Dk]   output projection
                  *refs,               # (logits_ref?,) out_ref, kv_scratch
                  emit_logits: bool):
    if emit_logits:
        logits_ref, out_ref, kv_ref = refs
    else:
        out_ref, kv_ref = refs

    rank = wq_ref.shape[1]

    # temperature.clamp(min=1e-8) → reciprocal once, on the scalar path.
    inv_temp = 1.0 / jnp.maximum(temp_ref[0], 1e-8)

    # Fused K/V projection of the resident side: computed once on the first
    # grid step into VMEM scratch and reused by every query tile.
    @pl.when(pl.program_id(0) == 0)
    def _():
        kv_ref[...] = jnp.dot(k_ref[...].astype(jnp.float32), wkv_ref[...],
                              preferred_element_type=jnp.float32)

    kv = kv_ref[...]
    k_r = kv[:, :rank]          # [Nk, R]  (rank is a multiple of 128 → aligned slice)
    v_r = kv[:, rank:]          # [Nk, R]

    q = q_ref[...].astype(jnp.float32)
    # Fold the temperature into the small rank-space Q tensor ([TQ, R] VPU work
    # instead of a pass over the full [TQ, Nk] logits).
    q_r = jnp.dot(q, wq_ref[...], preferred_element_type=jnp.float32) * inv_temp

    # Q @ K^T without materializing a transpose: contract last dims directly.
    logits = lax.dot_general(q_r, k_r,
                             dimension_numbers=(((1,), (1,)), ((), ())),
                             preferred_element_type=jnp.float32)       # [TQ, Nk]

    if emit_logits:
        logits_ref[...] = logits

    m = jnp.max(logits, axis=-1, keepdims=True)
    e = jnp.exp(logits - m)
    denom = jnp.sum(e, axis=-1, keepdims=True)
    attn = e * pl.reciprocal(denom, approx=True)                        # EUP rcp

    ctx = jnp.dot(attn, v_r, preferred_element_type=jnp.float32)        # [TQ, R]
    out_ref[...] = jnp.dot(ctx, wout_ref[...],
                           preferred_element_type=jnp.float32)          # [TQ, Dk]


def _lowrank_xattn(q_feats, k_feats, wq, wkv, wout, temp, *,
                   tile_q=128, emit_logits=True):
    """One attention direction.  All non-token dims are already padded."""
    nq, dq = q_feats.shape
    nk, dk = k_feats.shape
    rank = wq.shape[1]
    assert wkv.shape == (dk, 2 * rank) and wout.shape == (rank, dk)

    # Query-tile size: multiple of 8 sublanes; pad the query-token axis so the
    # grid divides evenly (padded rows are sliced off by the caller).
    tq = max(8, min(_round_up(tile_q, 8), _round_up(nq, 8)))
    nq_pad = _round_up(nq, tq)
    if nq_pad != nq:
        q_feats = jnp.pad(q_feats, ((0, nq_pad - nq), (0, 0)))
    grid = (nq_pad // tq,)

    smem = pltpu.MemorySpace.SMEM
    in_specs = [
        pl.BlockSpec(memory_space=smem),                  # temperature scalar
        pl.BlockSpec((tq, dq), lambda i: (i, 0)),         # query tile (pipelined)
        pl.BlockSpec((nk, dk), lambda i: (0, 0)),         # key-side features (resident)
        pl.BlockSpec((dq, rank), lambda i: (0, 0)),       # Wq (resident)
        pl.BlockSpec((dk, 2 * rank), lambda i: (0, 0)),   # fused Wk|Wv (resident)
        pl.BlockSpec((rank, dk), lambda i: (0, 0)),       # Wout (resident)
    ]

    out_shape = []
    out_specs = []
    if emit_logits:
        out_shape.append(jax.ShapeDtypeStruct((nq_pad, nk), jnp.float32))
        out_specs.append(pl.BlockSpec((tq, nk), lambda i: (i, 0)))
    out_shape.append(jax.ShapeDtypeStruct((nq_pad, dk), jnp.float32))
    out_specs.append(pl.BlockSpec((tq, dk), lambda i: (i, 0)))

    kernel = functools.partial(_xattn_kernel, emit_logits=emit_logits)

    return pl.pallas_call(
        kernel,
        grid=grid,
        in_specs=in_specs,
        out_specs=tuple(out_specs),
        out_shape=tuple(out_shape),
        scratch_shapes=[pltpu.VMEM((nk, 2 * rank), jnp.float32)],
        # The grid axis carries the K/V-projection scratch initialised at step
        # 0, so it must stay "arbitrary".  The two attention directions are
        # fully independent pallas_calls.
        compiler_params=pltpu.CompilerParams(
            dimension_semantics=("arbitrary",)),
    )(temp, q_feats, k_feats, wq, wkv, wout)


def rank_attention_forward(vision_features, text_features, params, *, tile_q=128):
    """Matches RankAttentionModel.forward:
    returns (attention_logits, v2t_aligned_features, t2v_aligned_features)."""
    nv, dv = vision_features.shape
    nt, dt = text_features.shape

    rank = params["vision_proj_q"].shape[0]
    rank_p = _round_up(rank, 128)
    dv_p = _round_up(dv, 128)
    dt_p = _round_up(dt, 128)

    def prep(w, rows, cols):
        # torch Linear [out, in] → transpose to [in, out], zero-pad once.
        wt = w.T
        return jnp.pad(wt, ((0, rows - wt.shape[0]), (0, cols - wt.shape[1])))

    wvq = prep(params["vision_proj_q"], dv_p, rank_p)
    wtq = prep(params["text_proj_q"], dt_p, rank_p)
    # Fused K|V projection weight per modality → one matmul for both.
    w_t_kv = jnp.concatenate([prep(params["text_proj_k"], dt_p, rank_p),
                              prep(params["text_proj_v"], dt_p, rank_p)], axis=1)
    w_v_kv = jnp.concatenate([prep(params["vision_proj_k"], dv_p, rank_p),
                              prep(params["vision_proj_v"], dv_p, rank_p)], axis=1)
    wv2t = prep(params["v2t_output_proj"], rank_p, dt_p)
    wt2v = prep(params["t2v_output_proj"], rank_p, dv_p)

    # Features stay in their native dtype (cast happens per tile in the kernel).
    v = jnp.pad(vision_features, ((0, 0), (0, dv_p - dv)))
    t = jnp.pad(text_features, ((0, 0), (0, dt_p - dt)))

    temp = jnp.reshape(params["temperature"].astype(jnp.float32), (1,))

    # vision -> text (emits the attention logits the module returns)
    logits_p, v2t_p = _lowrank_xattn(v, t, wvq, w_t_kv, wv2t, temp,
                                     tile_q=tile_q, emit_logits=True)
    # text -> vision (its logits are not a module output → not written)
    (t2v_p,) = _lowrank_xattn(t, v, wtq, w_v_kv, wt2v, temp,
                              tile_q=tile_q, emit_logits=False)

    return (logits_p[:nv, :nt], v2t_p[:nv, :dt], t2v_p[:nt, :dv])


def reference_forward(vision_features, text_features, params):
    v = vision_features.astype(jnp.float32)
    t = text_features.astype(jnp.float32)
    temp = jnp.maximum(params["temperature"], 1e-8)
    vq = v @ params["vision_proj_q"].T
    tk = t @ params["text_proj_k"].T
    logits = (vq @ tk.T) / temp
    attn = jax.nn.softmax(logits, axis=-1)
    tv = t @ params["text_proj_v"].T
    v2t = (attn @ tv) @ params["v2t_output_proj"].T
    tq = t @ params["text_proj_q"].T
    vk = v @ params["vision_proj_k"].T
    rlogits = (tq @ vk.T) / temp
    rattn = jax.nn.softmax(rlogits, axis=-1)
    vv = v @ params["vision_proj_v"].T
    t2v = (rattn @ vv) @ params["t2v_output_proj"].T
    return logits, v2t, t2v


def init_params(key, vision_dim, text_dim, rank, temperature=0.07):
    ks = jax.random.split(key, 8)

    def linear_w(k, out_dim, in_dim):
        bound = 1.0 / jnp.sqrt(jnp.float32(in_dim))
        return jax.random.uniform(k, (out_dim, in_dim), jnp.float32, -bound, bound)

    return {
        "vision_proj_q": linear_w(ks[0], rank, vision_dim),
        "vision_proj_k": linear_w(ks[1], rank, vision_dim),
        "vision_proj_v": linear_w(ks[2], rank, vision_dim),
        "text_proj_q": linear_w(ks[3], rank, text_dim),
        "text_proj_k": linear_w(ks[4], rank, text_dim),
        "text_proj_v": linear_w(ks[5], rank, text_dim),
        "v2t_output_proj": linear_w(ks[6], text_dim, rank),
        "t2v_output_proj": linear_w(ks[7], vision_dim, rank),
        "temperature": jnp.float32(temperature),
    }


if __name__ == "__main__":
    vision_dim, text_dim, rank = 32, 24, 16
    Nv, Nt = 16, 8

    key = jax.random.PRNGKey(0)
    kp, kvis, ktxt = jax.random.split(key, 3)
    params = init_params(kp, vision_dim, text_dim, rank)
    vision = jax.random.normal(kvis, (Nv, vision_dim), jnp.float32)
    text = jax.random.normal(ktxt, (Nt, text_dim), jnp.float32)

    # tile_q=8 exercises a multi-step query grid (Nv=16 → 2 tiles) and the
    # step-0 K/V scratch reuse path.
    outs = rank_attention_forward(vision, text, params, tile_q=8)
    outs = jax.block_until_ready(outs)

    refs = reference_forward(vision, text, params)
    names = ("attention_logits", "v2t_aligned_features", "t2v_aligned_features")
    for name, o, r in zip(names, outs, refs):
        assert o.shape == r.shape and o.dtype == jnp.float32, name
        # Tolerance leaves headroom for the EUP approximate reciprocal used in
        # the softmax normalization (uniform per-row relative perturbation).
        assert jnp.allclose(o, r, atol=2e-3, rtol=5e-3), name

    print("KERNEL_OK")
</pallas_src>

<mosaic_0001>
module attributes {stable_mosaic.version = 11 : i64} {
  func.func @_xattn_kernel(%arg0: i32, %arg1: memref<1xf32, #tpu.memory_space<smem>>, %arg2: memref<8x128xf32, #tpu.memory_space<vmem>>, %arg3: memref<8x128xf32, #tpu.memory_space<vmem>>, %arg4: memref<128x128xf32, #tpu.memory_space<vmem>>, %arg5: memref<128x256xf32, #tpu.memory_space<vmem>>, %arg6: memref<128x128xf32, #tpu.memory_space<vmem>>, %arg7: memref<8x8xf32, #tpu.memory_space<vmem>>, %arg8: memref<8x128xf32, #tpu.memory_space<vmem>>, %arg9: memref<8x256xf32, #tpu.memory_space<vmem>>) attributes {dimension_semantics = [#tpu.dimension_semantics<arbitrary>], iteration_bounds = array<i64: 2>, scalar_prefetch = 0 : i64, scratch_operands = 1 : i64, tpu.core_type = #tpu.core_type<tc>, window_params = [{transform_indices = @transform_0, window_bounds = array<i64: 1>}, {transform_indices = @transform_1, window_bounds = array<i64: 8, 128>}, {pipeline_mode = #tpu.pipeline_mode<synchronous>, transform_indices = @transform_2, window_bounds = array<i64: 8, 128>}, {pipeline_mode = #tpu.pipeline_mode<synchronous>, transform_indices = @transform_3, window_bounds = array<i64: 128, 128>}, {pipeline_mode = #tpu.pipeline_mode<synchronous>, transform_indices = @transform_4, window_bounds = array<i64: 128, 256>}, {pipeline_mode = #tpu.pipeline_mode<synchronous>, transform_indices = @transform_5, window_bounds = array<i64: 128, 128>}, {transform_indices = @transform_6, window_bounds = array<i64: 8, 8>}, {transform_indices = @transform_7, window_bounds = array<i64: 8, 128>}]} {
    %c0 = arith.constant 0 : index
    %0 = memref.load %arg1[%c0] : memref<1xf32, #tpu.memory_space<smem>>
    %cst = arith.constant 9.99999993E-9 : f32
    %1 = arith.maximumf %0, %cst : f32
    %cst_0 = arith.constant 1.000000e+00 : f32
    %2 = arith.divf %cst_0, %1 : f32
    %c0_i32 = arith.constant 0 : i32
    %3 = arith.cmpi eq, %arg0, %c0_i32 : i32
    %4 = arith.extui %3 : i1 to i32
    %c0_i32_1 = arith.constant 0 : i32
    %5 = arith.cmpi ne, %4, %c0_i32_1 : i32
    scf.if %5 {
      %c0_20 = arith.constant 0 : index
      %c0_21 = arith.constant 0 : index
      %30 = vector.load %arg3[%c0_20, %c0_21] : memref<8x128xf32, #tpu.memory_space<vmem>>, vector<8x128xf32>
      %c0_22 = arith.constant 0 : index
      %c0_23 = arith.constant 0 : index
      %31 = vector.load %arg5[%c0_22, %c0_23] : memref<128x256xf32, #tpu.memory_space<vmem>>, vector<128x256xf32>
      %cst_24 = arith.constant dense<0.000000e+00> : vector<8x256xf32>
      %32 = tpu.matmul %30, %31, %cst_24 {dimension_numbers = #tpu.dot_dimension_numbers<[1], [0], [0], [1], [0, 0, 1, 1], [], []>} : vector<8x128xf32>, vector<128x256xf32>, vector<8x256xf32> -> vector<8x256xf32>
      %c0_25 = arith.constant 0 : index
      %c0_26 = arith.constant 0 : index
      %33 = vector.load %arg9[%c0_25, %c0_26] : memref<8x256xf32, #tpu.memory_space<vmem>>, vector<8x256xf32>
      tpu.vector_store %arg9[%c0_25, %c0_26], %32 {strides = array<i32>} : memref<8x256xf32, #tpu.memory_space<vmem>>, vector<8x256xf32>,
    } else {
    }
    %c0_2 = arith.constant 0 : index
    %c0_3 = arith.constant 0 : index
    %6 = vector.load %arg9[%c0_2, %c0_3] : memref<8x256xf32, #tpu.memory_space<vmem>>, vector<8x256xf32>
    %7 = vector.extract_strided_slice %6 {offsets = [0, 0], sizes = [8, 128], strides = [1, 1]} : vector<8x256xf32> to vector<8x128xf32>
    %8 = vector.extract_strided_slice %6 {offsets = [0, 128], sizes = [8, 128], strides = [1, 1]} : vector<8x256xf32> to vector<8x128xf32>
    %c0_4 = arith.constant 0 : index
    %c0_5 = arith.constant 0 : index
    %9 = vector.load %arg2[%c0_4, %c0_5] : memref<8x128xf32, #tpu.memory_space<vmem>>, vector<8x128xf32>
    %c0_6 = arith.constant 0 : index
    %c0_7 = arith.constant 0 : index
    %10 = vector.load %arg4[%c0_6, %c0_7] : memref<128x128xf32, #tpu.memory_space<vmem>>, vector<128x128xf32>
    %cst_8 = arith.constant dense<0.000000e+00> : vector<8x128xf32>
    %11 = tpu.matmul %9, %10, %cst_8 {dimension_numbers = #tpu.dot_dimension_numbers<[1], [0], [0], [1], [0, 0, 1, 1], [], []>} : vector<8x128xf32>, vector<128x128xf32>, vector<8x128xf32> -> vector<8x128xf32>
    %12 = vector.broadcast %2 : f32 to vector<8x128xf32>
    %13 = arith.mulf %11, %12 : vector<8x128xf32>
    %cst_9 = arith.constant dense<0.000000e+00> : vector<8x8xf32>
    %14 = tpu.matmul %13, %7, %cst_9 {dimension_numbers = #tpu.dot_dimension_numbers<[1], [1], [0], [0], [0, 0, 1, 0], [], []>} : vector<8x128xf32>, vector<8x128xf32>, vector<8x8xf32> -> vector<8x8xf32>
    %c0_10 = arith.constant 0 : index
    %c0_11 = arith.constant 0 : index
    %15 = vector.load %arg7[%c0_10, %c0_11] : memref<8x8xf32, #tpu.memory_space<vmem>>, vector<8x8xf32>
    tpu.vector_store %arg7[%c0_10, %c0_11], %14 {strides = array<i32>} : memref<8x8xf32, #tpu.memory_space<vmem>>, vector<8x8xf32>,
    %cst_12 = arith.constant dense<0xFF800000> : vector<8xf32>
    %16 = vector.multi_reduction <maximumf>, %14, %cst_12 [1] : vector<8x8xf32> to vector<8xf32>
    %17 = vector.shape_cast %16 : vector<8xf32> to vector<8x1xf32>
    %18 = vector.broadcast %17 : vector<8x1xf32> to vector<8x8xf32>
    %19 = arith.subf %14, %18 : vector<8x8xf32>
    %20 = math.exp %19 : vector<8x8xf32>
    %cst_13 = arith.constant dense<0.000000e+00> : vector<8xf32>
    %21 = vector.multi_reduction <add>, %20, %cst_13 [1] : vector<8x8xf32> to vector<8xf32>
    %22 = vector.shape_cast %21 : vector<8xf32> to vector<8x1xf32>
    %23 = tpu.reciprocal %22 {approx = true} : vector<8x1xf32> -> vector<8x1xf32>
    %24 = vector.broadcast %23 : vector<8x1xf32> to vector<8x8xf32>
    %25 = arith.mulf %20, %24 : vector<8x8xf32>
    %cst_14 = arith.constant dense<0.000000e+00> : vector<8x128xf32>
    %26 = tpu.matmul %25, %8, %cst_14 {dimension_numbers = #tpu.dot_dimension_numbers<[1], [0], [0], [1], [0, 0, 1, 1], [], []>} : vector<8x8xf32>, vector<8x128xf32>, vector<8x128xf32> -> vector<8x128xf32>
    %c0_15 = arith.constant 0 : index
    %c0_16 = arith.constant 0 : index
    %27 = vector.load %arg6[%c0_15, %c0_16] : memref<128x128xf32, #tpu.memory_space<vmem>>, vector<128x128xf32>
    %cst_17 = arith.constant dense<0.000000e+00> : vector<8x128xf32>
    %28 = tpu.matmul %26, %27, %cst_17 {dimension_numbers = #tpu.dot_dimension_numbers<[1], [0], [0], [1], [0, 0, 1, 1], [], []>} : vector<8x128xf32>, vector<128x128xf32>, vector<8x128xf32> -> vector<8x128xf32>
    %c0_18 = arith.constant 0 : index
    %c0_19 = arith.constant 0 : index
    %29 = vector.load %arg8[%c0_18, %c0_19] : memref<8x128xf32, #tpu.memory_space<vmem>>, vector<8x128xf32>
    tpu.vector_store %arg8[%c0_18, %c0_19], %28 {strides = array<i32>} : memref<8x128xf32, #tpu.memory_space<vmem>>, vector<8x128xf32>,
    return
  }
  func.func @transform_0(%arg0: i32) -> i32 {
    %c0_i32 = arith.constant 0 : i32
    %c0_i32_0 = arith.constant 0 : i32
    return %c0_i32 : i32
  }
  func.func @transform_1(%arg0: i32) -> (i32, i32) {
    %c0_i32 = arith.constant 0 : i32
    %c0_i32_0 = arith.constant 0 : i32
    return %arg0, %c0_i32 : i32, i32
  }
  func.func @transform_2(%arg0: i32) -> (i32, i32) {
    %c0_i32 = arith.constant 0 : i32
    %c0_i32_0 = arith.constant 0 : i32
    %c0_i32_1 = arith.constant 0 : i32
    return %c0_i32, %c0_i32_0 : i32, i32
  }
  func.func @transform_3(%arg0: i32) -> (i32, i32) {
    %c0_i32 = arith.constant 0 : i32
    %c0_i32_0 = arith.constant 0 : i32
    %c0_i32_1 = arith.constant 0 : i32
    return %c0_i32, %c0_i32_0 : i32, i32
  }
  func.func @transform_4(%arg0: i32) -> (i32, i32) {
    %c0_i32 = arith.constant 0 : i32
    %c0_i32_0 = arith.constant 0 : i32
    %c0_i32_1 = arith.constant 0 : i32
    return %c0_i32, %c0_i32_0 : i32, i32
  }
  func.func @transform_5(%arg0: i32) -> (i32, i32) {
    %c0_i32 = arith.constant 0 : i32
    %c0_i32_0 = arith.constant 0 : i32
    %c0_i32_1 = arith.constant 0 : i32
    return %c0_i32, %c0_i32_0 : i32, i32
  }
  func.func @transform_6(%arg0: i32) -> (i32, i32) {
    %c0_i32 = arith.constant 0 : i32
    %c0_i32_0 = arith.constant 0 : i32
    return %arg0, %c0_i32 : i32, i32
  }
  func.func @transform_7(%arg0: i32) -> (i32, i32) {
    %c0_i32 = arith.constant 0 : i32
    %c0_i32_0 = arith.constant 0 : i32
    return %arg0, %c0_i32 : i32, i32
  }
}

</mosaic_0001>

<bundles_post_ra>
// kernel: tpu_custom_call.1
= control target key start
LH: loop header
LB: loop body
LE: loop exit
PB: predicated region body
PF: predicated region fallthrough
CT: control target
= control target key end

     0   :  { %s1753_s0 = inlined_call_operand.<no memory space> [shape: f32[1], index: 0, kind: input, shape index: {}]   ;;  %s1754_s1 = inlined_call_operand.hbm [shape: f32[16,128], index: 1, kind: input, shape index: {}]   ;;  %s1755_s2 = inlined_call_operand.hbm [shape: f32[8,128], index: 2, kind: input, shape index: {}]   ;;  %s1756_s3 = inlined_call_operand.hbm [shape: f32[128,128], index: 3, kind: input, shape index: {}]   ;;  %s1757_s4 = inlined_call_operand.hbm [shape: f32[128,256], index: 4, kind: input, shape index: {}]   ;;  %s1758_s5 = inlined_call_operand.hbm [shape: f32[128,128], index: 5, kind: input, shape index: {}]   ;;  %s1759_s6 = inlined_call_operand.vmem [shape: f32[16,8], index: 6, kind: output, shape index: {0}]   ;;  %s1760_s7 = inlined_call_operand.hbm [shape: f32[16,128], index: 7, kind: output, shape index: {1}]  }
   0x1   :  { %1765 = sst [smem:[#allocation18_spill]] %s1755_s2 }
   0x2   :  { %13 = sst [smem:[#allocation3]] %s1753_s0 }
   0x3   :  { %14 = vsyncpa [#allocation5], 0 }
   0x4   :  { %16 = vsyncpa [#allocation5 + $0x1], 0 }
   0x5   :  { %17 = vsyncpa [#allocation8], 0 }
   0x6   :  { %18 = vsyncpa [#allocation11], 0 }
   0x7   :  { %19 = vsyncpa [#allocation6], 0 }
   0x8   :  { %21 = vsyncpa [#allocation6 + $0x1], 0  ;;  %s1471_s26 = smov 0   ;;  %s1473_s27 = smov 0  }
   0x9   :  { %s1475_s28 = smov 0   ;;  %s1477_s29 = smov 0  }
   0xa LB: > { %s1414_s0 = smov [#allocation7]   ;;  %s1492_s8 = sadd.s32 4294967295, %s1412_s29   ;;  %s1412_s29 = sphi %s1477_s29, %s1787_s29   ;;  %s1408_s28 = sphi %s1475_s28, %s1786_s28   ;;  %s1404_s27 = sphi %s1473_s27, %s1785_s27   ;;  %s1400_s26 = sphi %s1471_s26, %s1784_s26  }
   0xb   : > { %s231_s30 = sshll.u32 %s1414_s0, 4  ;;  %p965_p0 = scmp.ge.s32.totalorder %s1412_s29, 1  ;;  %s232_s30 = int_to_ptr.vmem [resolvable:$true] %s231_s30 }
   0xc   : > { %p1761_p1 = scmp.eq.s32.totalorder %s1492_s8, 0  ;;  %p215_p2 = scmp.lt.s32.totalorder %s1412_s29, 3 }
   0xd   : > { %s1415_s10 = smov [#allocation10]   ;;  %s1416_s13 = smov [#allocation9]  }
   0xe   : > { %p1498_p4 = pnand %p965_p0, %p215_p2  ;;  %s254_s11 = sshll.u32 %s1415_s10, 4  ;;  %s1505_s11 = int_to_ptr.vmem [resolvable:$true] %s254_s11 }
   0xf   : > { %s241_s14 = sshll.u32 %s1416_s13, 4  ;;  %s1219_s15 = scalar_lea.vmem %s232_s30, 128  ;;  %s1513_s14 = int_to_ptr.vmem [resolvable:$true] %s241_s14 }
  0x10   : > { %s1766_s9 = scalar_select %p1498_p4, 1, 0 }
  0x11   : > { %p1127_p6 = pneg %p1498_p4  ;;  %p1220_p9 = scmp.ne.s32.totalorder %s232_s30, %s1219_s15 }
  0x12   : > { %p1227_p12 = scmp.lt.s32.totalorder %s232_s30, %s232_s30  ;;  %p1228_p13 = scmp.lt.s32.totalorder %s1219_s15, %s1219_s15 }
  0x13   : > { %p1509_p7 = pnand %p1127_p6, %p1761_p1 }
  0x14   : > { %p1229_p0 = por %p1228_p13, %p1227_p12 }
  0x15   : > { %p1210_p8 = pneg %p1509_p7 }
  0x17   : > { %p1222_p10 = pnand %p1220_p9, %p1210_p8 }
  0x19   : > { %p1223_p11 = pneg %p1222_p10 }
  0x1b   : > { %p1230_p2 = pnand %p1229_p0, %p1223_p11 }
  0x1d   : > { %1233 = shalt.err (!%p1230_p2)
}
  0x1e   : > { %s1768_s2 = sld [smem:[#allocation18_spill]]  ;;  %s1245_s18 = scalar_lea.vmem %s1505_s11, 4096 }
  0x1f   : > { %p1246_p6 = scmp.ne.s32.totalorder %s1505_s11, %s1245_s18  ;;  %p1253_p12 = scmp.lt.s32.totalorder %s1505_s11, %s1505_s11 }
  0x20   : > { %p1254_p11 = scmp.lt.s32.totalorder %s1245_s18, %s1245_s18 }
  0x21   : > { %p1248_p9 = pnand %p1246_p6, %p1210_p8 }
  0x22   : > { %p1255_p13 = por %p1254_p11, %p1253_p12 }
  0x23   : > { %p1249_p10 = pneg %p1248_p9 }
  0x24   : > { %1130 = dma.hbm_to_vmem [thread:$0]  (!%p1509_p7), %s1768_s2, 128, %s232_s30, [#allocation8]  }
  0x25   : > { %p1256_p0 = pnand %p1255_p13, %p1249_p10 }
  0x27   : > { %1259 = shalt.err (!%p1256_p0)
}
  0x28   : > { %s1417_s19 = smov 256   ;;  %s1418_s20 = smov 16  }
  0x29   : > { %1136 = dma.hbm_to_vmem [thread:$0]  (!%p1509_p7), %s1757_s4, 4096, %s1505_s11, [#allocation11], %s1417_s19, %s1417_s19, %s1418_s20  }
  0x2a   : > { %s1271_s23 = scalar_lea.vmem %s1513_s14, 2048  ;;  %p1279_p10 = scmp.lt.s32.totalorder %s1513_s14, %s1513_s14 }
  0x2b   : > { %p1272_p2 = scmp.ne.s32.totalorder %s1513_s14, %s1271_s23  ;;  %p1280_p12 = scmp.lt.s32.totalorder %s1271_s23, %s1271_s23 }
  0x2d   : > { %p1274_p6 = pnand %p1272_p2, %p1210_p8  ;;  %p1281_p11 = por %p1280_p12, %p1279_p10 }
  0x2f   : > { %p1275_p9 = pneg %p1274_p6 }
  0x31   : > { %p1282_p13 = pnand %p1281_p11, %p1275_p9 }
  0x33   : > { %1285 = shalt.err (!%p1282_p13)
}
  0x34   : > { %s1419_s24 = smov 128   ;;  %s1420_s25 = smov 8  }
  0x35   : > { %1133 = dma.hbm_to_vmem [thread:$0]  (!%p1509_p7), %s1756_s3, 2048, %s1513_s14, [#allocation8], %s1419_s24, %s1419_s24, %s1420_s25  }
  0x36   : > { %s1421_s10 = smov [#allocation12]  }
  0x37   : > { %s267_s11 = sshll.u32 %s1421_s10, 4  ;;  %s268_s11 = int_to_ptr.vmem [resolvable:$true] %s267_s11 }
  0x38   : > { %s1297_s13 = scalar_lea.vmem %s268_s11, 2048  ;;  %p1305_p9 = scmp.lt.s32.totalorder %s268_s11, %s268_s11 }
  0x39   : > { %p1298_p0 = scmp.ne.s32.totalorder %s268_s11, %s1297_s13  ;;  %p1306_p10 = scmp.lt.s32.totalorder %s1297_s13, %s1297_s13 }
  0x3b   : > { %p1300_p2 = pnand %p1298_p0, %p1210_p8  ;;  %p1307_p12 = por %p1306_p10, %p1305_p9 }
  0x3d   : > { %p1301_p6 = pneg %p1300_p2 }
  0x3f   : > { %p1308_p11 = pnand %p1307_p12, %p1301_p6 }
  0x41   : > { %1311 = shalt.err (!%p1308_p11)
}
  0x42   : > { %1139 = dma.hbm_to_vmem [thread:$0]  (!%p1509_p7), %s1758_s5, 2048, %s268_s11, [#allocation11], %s1419_s24, %s1419_s24, %s1420_s25  }
  0x43   : > { %s964_s14 = sadd.s32 4294967294, %s1412_s29   ;;  %s1561_s12 = sadd.s32 1, %s1412_s29  }
  0x44   : > { %s52_s17 = ssub.s32 %s1412_s29, %s1561_s12  ;;  %s55_s18 = sadd.s32 1, %s1408_s28 }
  0x45   : > { %p53_p8 = scmp.eq.s32.totalorder %s52_s17, 0  ;;  %p62_p13 = scmp.ne.s32.totalorder %s1408_s28, %s1404_s27 }
  0x46   : > { %p63_p0 = scmp.eq.s32.totalorder %s1412_s29, 0  ;;  %p68_p2 = scmp.ne.s32.totalorder %s1404_s27, %s1400_s26 }
  0x47   : > { %s1572_s19 = scalar_select %p53_p8, %s1408_s28, %s55_s18  }
  0x48   : > { %p1574_p6 = por %p63_p0, %p62_p13  ;;  %p1580_p7 = por %p1761_p1, %p68_p2 }
  0x49   : > { %p202_p9 = scmp.eq.s32.totalorder %s1492_s8, 1  ;;  %p208_p10 = scmp.eq.s32.totalorder %s964_s14, 1 }
  0x4a   : > { %s1770_s21 = scalar_select %p1580_p7, 1, 0 }
  0x4b   : > { %p1152_p12 = scmp.lt.s32.totalorder %s1412_s29, 2  ;;  %s281_s22 = sand.u32 1, %s1408_s28  }
  0x4c   : > { %p1587_p11 = por %p202_p9, %p62_p13  ;;  %p1591_p8 = por %p208_p10, %p68_p2 }
  0x4d   : > { %s971_s25 = sshll.u32 %s281_s22, 3  ;;  %s972_s0 = sshll.u32 %s1412_s29, 7 }
  0x4e   : > { %s1771_s23 = scalar_select %p1587_p11, 1, 0 }
  0x4f   : > { %s1772_s24 = scalar_select %p1591_p8, 1, 0 }
  0x50   : > { %s1599_s11 = scalar_lea.hbm %s1754_s1, %s972_s0  ;;  %s285_s13 = scalar_lea.vmem [#allocation4], %s971_s25 }
  0x51   : > { %s292_s15 = sshll.u32 %s285_s13, 4  ;;  %p1603_p13 = pnand %p1152_p12, %p1574_p6  ;;  %s293_s15 = int_to_ptr.vmem [resolvable:$true] %s292_s15 }
  0x52   : > { %s282_s14 = scalar_lea.sflag [#allocation5], %s281_s22  ;;  %s1312_s17 = scalar_lea.hbm %s1599_s11, 128 }
  0x53   : > { %p1313_p0 = scmp.ne.s32.totalorder %s1599_s11, %s1312_s17  ;;  %p1314_p2 = pneg %p1603_p13 }
  0x54   : > { %s1317_s30 = scalar_lea.hbm %s1754_s1, 256  ;;  %p1318_p5 = scmp.lt.s32.totalorder %s1599_s11, %s1754_s1 }
  0x55   : > { %p1315_p9 = pnand %p1314_p2, %p1313_p0  ;;  %p1319_p6 = scmp.lt.s32.totalorder %s1317_s30, %s1312_s17 }
  0x57   : > { %p1316_p10 = pneg %p1315_p9  ;;  %p1320_p12 = por %p1319_p6, %p1318_p5 }
  0x59   : > { %p1321_p3 = pnand %p1320_p12, %p1316_p10 }
  0x5b   : > { %1324 = shalt.err (!%p1321_p3)
}
  0x5c   : > { %s1325_s20 = scalar_lea.vmem %s293_s15, 128  ;;  %s1422_s22 = smov [#allocation4]  }
  0x5d   : > { %p1326_p1 = scmp.ne.s32.totalorder %s293_s15, %s1325_s20  ;;  %s1330_s13 = sshll.u32 %s1422_s22, 4  ;;  %s1331_s13 = int_to_ptr.vmem [resolvable:$false] %s1330_s13 }
  0x5e   : > { %s1332_s2 = scalar_lea.vmem %s1331_s13, 256  ;;  %p1333_p0 = scmp.lt.s32.totalorder %s293_s15, %s1331_s13 }
  0x5f   : > { %p1328_p8 = pnand %p1326_p1, %p1314_p2  ;;  %p1334_p9 = scmp.lt.s32.totalorder %s1332_s2, %s1325_s20 }
  0x61   : > { %p1329_p11 = pneg %p1328_p8  ;;  %p1335_p7 = por %p1334_p9, %p1333_p0 }
  0x63   : > { %p1336_p4 = pnand %p1335_p7, %p1329_p11 }
  0x65   : > { %1339 = shalt.err (!%p1336_p4)
}
  0x66   : > { %1143 = dma.hbm_to_vmem [thread:$0]  (!%p1603_p13), %s1599_s11, 128, %s293_s15, %s282_s14  }
  0x67   : > { %p1774_p5 = scmp.ne.s32.totalorder %s1766_s9, 0 }
  0x68   : > { %s1624_s17 = sand.u32 (!%p1774_p5), 1, %s1404_s27   ;;  %p1775_p1 = scmp.ne.s32.totalorder (!%p1774_p5), %s1770_s21, 0 }
  0x69   : > { %301 = sbr.rel (%p1774_p5) target bundleno = 1551 (0x60f), region = 44  ;;  %s974_s18 = sshll.u32 (!%p1774_p5), %s1624_s17, 3 }
  0x6a   : > { %s304_s0 = scalar_lea.sflag (!%p1774_p5), [#allocation5], %s1624_s17  ;;  %s1628_s30 = scalar_lea.vmem (!%p1774_p5), [#allocation4], %s974_s18 }
  0x6e   : > { %1383 = dma.done.wait (%p1775_p1), %s304_s0, 128  }
  0x6f   : > { %1385 = vsyncadd (%p1775_p1), %s304_s0, 4294967168  ;;  %p1776_p3 = scmp.eq.s32.totalorder %s1492_s8, 0 }
  0x71   : > { %1387 = dma.done.wait (%p1776_p3), [#allocation8], 2176   ;;  %p1777_p4 = pmov %p1776_p3 }
  0x72   : > { %p1778_p7 = pmov %p1776_p3 }
  0x73   : > { %1389 = vsyncadd (%p1777_p4), [#allocation8], 4294965120 }
  0x74   : > { %1391 = dma.done.wait (%p1778_p7), [#allocation11], 6144   ;;  %p1779_p11 = pmov %p1776_p3 }
  0x75   : > { %p358_p8 = scmp.lt.s32.totalorder %s1492_s8, 1  ;;  %s362_s2 = sld [smem:[#allocation3]] }
  0x76   : > { %1393 = vsyncadd (%p1779_p11), [#allocation11], 4294961152  ;;  %s1423_s14 = smov 1e-08   ;;  %s1651_s20 = scalar_lea.vmem [#allocation13], %s974_s18 }
  0x77   : > { %s359_s9 = scalar_select %p358_p8, %s1492_s8, 1 }
  0x78   : > { %p1780_p13 = scmp.ne.s32.totalorder %s1492_s8, 0 }
  0x79   : > { %s980_s11 = sshll.u32 %s359_s9, 3 }
  0x7a   : > { %s1647_s16 = scalar_lea.vmem %s1759_s6, %s980_s11 }
  0x7b   : > { %s363_s25 = smax.f32 %s1423_s14, %s362_s2 }
  0x7c   : > { %v364_v0 = vstv %s363_s25 }
  0x7d   : > { %1202 = vrcp.f32 %v364_v0 }
  0x8a   : > { %v1203_v1 = vpop.eup %1202 }
  0x8b   : > { %1105 = vpush %v1203_v1 }
  0xb8   : > { %370 = sbr.rel (%p1780_p13) target bundleno = 418 (0x1a2), region = 68 }
  0xbc   : > { %s1649_s10 = spop %1105 }
  0xbd   : > { %v403_v2 = vld [vmem:[#allocation10 + $0xf8] sm:$0xff]  ;;  %v402_v3 = vld [vmem:[#allocation10 + $0xf0] sm:$0xff]  ;;  %v401_v4 = vld [vmem:[#allocation10 + $0xe8] sm:$0xff]  ;;  %v1424_v6 = vmov 0.0  }
  0xbe   : > { %404 = vmatprep.subr.mxu0 %v403_v2  ;;  %v400_v5 = vld [vmem:[#allocation10 + $0xe0] sm:$0xff]  ;;  %468 = vmatprep.mubr.f32.mxu0 %v1424_v6  ;;  %v399_v7 = vld [vmem:[#allocation10 + $0xd8] sm:$0xff]  ;;  %v398_v8 = vld [vmem:[#allocation10 + $0xd0] sm:$0xff] }
  0xbf   : > { %405 = vmatpush1.msra.mxu0 %v402_v3  ;;  %v397_v9 = vld [vmem:[#allocation10 + $0xc8] sm:$0xff]  ;;  %v396_v10 = vld [vmem:[#allocation10 + $0xc0] sm:$0xff]  ;;  %v395_v11 = vld [vmem:[#allocation10 + $0xb8] sm:$0xff] }
  0xc0   : > { %406 = vmatprep.subr.mxu0 %v401_v4  ;;  %v394_v12 = vld [vmem:[#allocation10 + $0xb0] sm:$0xff]  ;;  %v393_v13 = vld [vmem:[#allocation10 + $0xa8] sm:$0xff]  ;;  %v392_v14 = vld [vmem:[#allocation10 + $0xa0] sm:$0xff] }
  0xc1   : > { %407 = vmatpush1.msra.mxu0 %v400_v5  ;;  %v391_v15 = vld [vmem:[#allocation10 + $0x98] sm:$0xff]  ;;  %v390_v16 = vld [vmem:[#allocation10 + $0x90] sm:$0xff]  ;;  %v389_v17 = vld [vmem:[#allocation10 + $0x88] sm:$0xff] }
  0xc2   : > { %408 = vmatprep.subr.mxu0 %v399_v7  ;;  %v388_v18 = vld [vmem:[#allocation10 + $0x80] sm:$0xff]  ;;  %v387_v19 = vld [vmem:[#allocation10 + $0x78] sm:$0xff]  ;;  %v386_v20 = vld [vmem:[#allocation10 + $0x70] sm:$0xff] }
  0xc3   : > { %409 = vmatpush1.msra.mxu0 %v398_v8  ;;  %v385_v21 = vld [vmem:[#allocation10 + $0x68] sm:$0xff]  ;;  %v384_v22 = vld [vmem:[#allocation10 + $0x60] sm:$0xff]  ;;  %v383_v23 = vld [vmem:[#allocation10 + $0x58] sm:$0xff] }
  0xc4   : > { %410 = vmatprep.subr.mxu0 %v397_v9  ;;  %v382_v24 = vld [vmem:[#allocation10 + $0x50] sm:$0xff]  ;;  %v381_v25 = vld [vmem:[#allocation10 + $0x48] sm:$0xff]  ;;  %v380_v26 = vld [vmem:[#allocation10 + $0x40] sm:$0xff] }
  0xc5   : > { %411 = vmatpush1.msra.mxu0 %v396_v10  ;;  %v379_v27 = vld [vmem:[#allocation10 + $0x38] sm:$0xff]  ;;  %v378_v28 = vld [vmem:[#allocation10 + $0x30] sm:$0xff]  ;;  %v377_v29 = vld [vmem:[#allocation10 + $0x28] sm:$0xff] }
  0xc6   : > { %412 = vmatprep.subr.mxu0 %v395_v11  ;;  %v376_v30 = vld [vmem:[#allocation10 + $0x20] sm:$0xff]  ;;  %v375_v31 = vld [vmem:[#allocation10 + $0x18] sm:$0xff]  ;;  %v374_v32 = vld [vmem:[#allocation10 + $0x10] sm:$0xff] }
  0xc7   : > { %413 = vmatpush1.msra.mxu0 %v394_v12  ;;  %v373_v33 = vld [vmem:[#allocation10 + $0x8] sm:$0xff]  ;;  %v372_v34 = vld [vmem:[#allocation10] sm:$0xff]  ;;  %v371_v35 = vld [vmem:[#allocation7] sm:$0xff] }
  0xc8   : > { %414 = vmatprep.subr.mxu0 %v393_v13 }
  0xc9   : > { %415 = vmatpush1.msra.mxu0 %v392_v14 }
  0xca   : > { %416 = vmatprep.subr.mxu0 %v391_v15 }
  0xcb   : > { %417 = vmatpush1.msra.mxu0 %v390_v16 }
  0xcc   : > { %418 = vmatprep.subr.mxu0 %v389_v17 }
  0xcd   : > { %419 = vmatpush1.msra.mxu0 %v388_v18 }
  0xce   : > { %420 = vmatprep.subr.mxu0 %v387_v19 }
  0xcf   : > { %421 = vmatpush1.msra.mxu0 %v386_v20 }
  0xd0   : > { %422 = vmatprep.subr.mxu0 %v385_v21 }
  0xd1   : > { %423 = vmatpush1.msra.mxu0 %v384_v22 }
  0xd2   : > { %424 = vmatprep.subr.mxu0 %v383_v23 }
  0xd3   : > { %425 = vmatpush1.msra.mxu0 %v382_v24 }
  0xd4   : > { %426 = vmatprep.subr.mxu0 %v381_v25 }
  0xd5   : > { %427 = vmatpush1.msra.mxu0 %v380_v26 }
  0xd6   : > { %428 = vmatprep.subr.mxu0 %v379_v27 }
  0xd7   : > { %429 = vmatpush1.msra.mxu0 %v378_v28 }
  0xd8   : > { %430 = vmatprep.subr.mxu0 %v377_v29 }
  0xd9   : > { %431 = vmatpush1.msra.mxu0 %v376_v30 }
  0xda   : > { %432 = vmatprep.subr.mxu0 %v375_v31 }
  0xdb   : > { %433 = vmatpush1.msra.mxu0 %v374_v32 }
  0xdc   : > { %434 = vmatprep.subr.mxu0 %v373_v33 }
  0xdd   : > { %435 = vmatpush1.msra.mxu0 %v372_v34 }
  0xde   : > { %469 = vmatmul.mubr.f32.vlgmr.msra.gmra.mxu0 %v371_v35 }
 0x19e   : > { %v470_v36 = vpop.f32.mrf.mxu0 }
 0x19f   : > { %475 = vst [vmem:[#allocation2] sm:$0xff] %v470_v36 }
 0x1a0   : > { %v472_v37 = vpop.f32.mrf.mxu0 }
 0x1a1   : > { %476 = vst [vmem:[#allocation2 + $0x8] sm:$0xff] %v472_v37 }
 0x1a2 PF: > { %v495_v38 = vld [vmem:[#allocation9 + $0x78] sm:$0xff]  ;;  %v1425_v39 = vmov 0.0   ;;  %v494_v40 = vld [vmem:[#allocation9 + $0x70] sm:$0xff]  ;;  %vm1426_vm0 = vmmov 0   ;;  %v493_v41 = vld [vmem:[#allocation9 + $0x68] sm:$0xff]  ;;  %v566_v57 = vstv %s1649_s10  ;;  %vm638_vm1 = vcmask 64512  }
 0x1a3   : > { %1025 = vmatprep.subr.mxu0 %v1425_v39  ;;  %1057 = vmatprep.mubr.msk.f32.mxu0 %vm1426_vm0, %v1425_v39  ;;  %v492_v42 = vld [vmem:[#allocation9 + $0x60] sm:$0xff]  ;;  %v491_v43 = vld [vmem:[#allocation9 + $0x58] sm:$0xff]  ;;  %v490_v44 = vld [vmem:[#allocation9 + $0x50] sm:$0xff]  ;;  %s984_s22 = sshll.u32 %s1492_s8, 7  ;;  %s832_s13 = sshll.u32 %s1651_s20, 4  ;;  %s1711_s13 = int_to_ptr.vmem [resolvable:$true] %s832_s13 }
 0x1a4   : > { %1026 = vmatpush3.msra.mxu0 %v495_v38  ;;  %1065 = vmatprep.subr.mxu1 %v1425_v39  ;;  %v489_v45 = vld [vmem:[#allocation9 + $0x48] sm:$0xff]  ;;  %v488_v46 = vld [vmem:[#allocation9 + $0x40] sm:$0xff]  ;;  %v487_v47 = vld [vmem:[#allocation9 + $0x38] sm:$0xff]  ;;  %s816_s2 = scalar_lea.sflag [#allocation6], %s1624_s17  ;;  %s1340_s9 = scalar_lea.vmem %s1711_s13, 128 }
 0x1a5   : > { %1027 = vmatprep.subr.mxu0 %v1425_v39  ;;  %1067 = vmatprep.mubr.msk.f32.mxu1 %vm1426_vm0, %v1425_v39  ;;  %v486_v48 = vld [vmem:[#allocation9 + $0x30] sm:$0xff]  ;;  %v485_v49 = vld [vmem:[#allocation9 + $0x28] sm:$0xff]  ;;  %v484_v50 = vld [vmem:[#allocation9 + $0x20] sm:$0xff]  ;;  %p1341_p2 = scmp.ne.s32.totalorder %s1711_s13, %s1340_s9  ;;  %p1781_p10 = scmp.ne.s32.totalorder %s1771_s23, 0 }
 0x1a6   : > { %1028 = vmatpush3.msra.mxu0 %v494_v40  ;;  %v483_v51 = vld [vmem:[#allocation9 + $0x18] sm:$0xff]  ;;  %v482_v52 = vld [vmem:[#allocation9 + $0x10] sm:$0xff]  ;;  %v481_v53 = vld [vmem:[#allocation9 + $0x8] sm:$0xff]  ;;  %s1427_s8 = smov [#allocation13]  }
 0x1a7   : > { %1029 = vmatprep.subr.mxu0 %v1425_v39  ;;  %v480_v54 = vld [vmem:[#allocation9] sm:$0xff]  ;;  %v479_v55 = vld [vmem:[%s1628_s30] sm:$0xff]  ;;  %v477_v56 = vld [vmem:[#allocation2] sm:$0xff]  ;;  %s1709_s30 = scalar_lea.hbm %s1760_s7, %s984_s22  ;;  %p1342_p6 = pnand %p1341_p2, %p1781_p10 }
 0x1a8   : > { %1030 = vmatpush3.msra.mxu0 %v493_v41  ;;  %v478_v5 = vld [vmem:[#allocation2 + $0x8] sm:$0xff]  ;;  %v739_v9 = vld [vmem:[#allocation12 + $0x78] sm:$0xff]  ;;  %v738_v10 = vld [vmem:[#allocation12 + $0x70] sm:$0xff]  ;;  %s1344_s11 = sshll.u32 %s1427_s8, 4  ;;  %s1345_s11 = int_to_ptr.vmem [resolvable:$false] %s1344_s11 }
 0x1a9   : > { %1031 = vmatprep.subr.mxu0 %v1425_v39  ;;  %1066 = vmatpush3.msra.mxu1 %v478_v5  ;;  %v737_v11 = vld [vmem:[#allocation12 + $0x68] sm:$0xff]  ;;  %v736_v12 = vld [vmem:[#allocation12 + $0x60] sm:$0xff]  ;;  %v735_v13 = vld [vmem:[#allocation12 + $0x58] sm:$0xff]  ;;  %p1343_p12 = pneg %p1342_p6  ;;  %s1346_s21 = scalar_lea.vmem %s1345_s11, 256 }
 0x1aa   : > { %1032 = vmatpush3.msra.mxu0 %v492_v42  ;;  %1070 = vmatprep.subr.mxu1 %v1425_v39  ;;  %v734_v14 = vld [vmem:[#allocation12 + $0x50] sm:$0xff]  ;;  %v733_v15 = vld [vmem:[#allocation12 + $0x48] sm:$0xff]  ;;  %v732_v16 = vld [vmem:[#allocation12 + $0x40] sm:$0xff]  ;;  %p1347_p0 = scmp.lt.s32.totalorder %s1711_s13, %s1345_s11  ;;  %p1348_p9 = scmp.lt.s32.totalorder %s1346_s21, %s1340_s9 }
 0x1ab   : > { %1033 = vmatprep.subr.mxu0 %v1425_v39  ;;  %v731_v17 = vld [vmem:[#allocation12 + $0x38] sm:$0xff]  ;;  %v730_v18 = vld [vmem:[#allocation12 + $0x30] sm:$0xff]  ;;  %v729_v19 = vld [vmem:[#allocation12 + $0x28] sm:$0xff] }
 0x1ac   : > { %1034 = vmatpush3.msra.mxu0 %v491_v43  ;;  %v728_v20 = vld [vmem:[#allocation12 + $0x20] sm:$0xff]  ;;  %v727_v21 = vld [vmem:[#allocation12 + $0x18] sm:$0xff]  ;;  %v726_v22 = vld [vmem:[#allocation12 + $0x10] sm:$0xff]  ;;  %p1349_p5 = por %p1348_p9, %p1347_p0 }
 0x1ad   : > { %1035 = vmatprep.subr.mxu0 %v1425_v39  ;;  %v725_v23 = vld [vmem:[#allocation12 + $0x8] sm:$0xff]  ;;  %v724_v24 = vld [vmem:[#allocation12] sm:$0xff] }
 0x1ae   : > { %1036 = vmatpush3.msra.mxu0 %v490_v44  ;;  %p1350_p1 = pnand %p1349_p5, %p1343_p12 }
 0x1af   : > { %1037 = vmatprep.subr.mxu0 %v1425_v39 }
 0x1b0   : > { %1038 = vmatpush3.msra.mxu0 %v489_v45 }
 0x1b1   : > { %1039 = vmatprep.subr.mxu0 %v1425_v39 }
 0x1b2   : > { %1040 = vmatpush3.msra.mxu0 %v488_v46 }
 0x1b3   : > { %1041 = vmatprep.subr.mxu0 %v1425_v39 }
 0x1b4   : > { %1042 = vmatpush3.msra.mxu0 %v487_v47 }
 0x1b5   : > { %1043 = vmatprep.subr.mxu0 %v1425_v39 }
 0x1b6   : > { %1044 = vmatpush3.msra.mxu0 %v486_v48 }
 0x1b7   : > { %1045 = vmatprep.subr.mxu0 %v1425_v39 }
 0x1b8   : > { %1046 = vmatpush3.msra.mxu0 %v485_v49 }
 0x1b9   : > { %1047 = vmatprep.subr.mxu0 %v1425_v39 }
 0x1ba   : > { %1048 = vmatpush3.msra.mxu0 %v484_v50 }
 0x1bb   : > { %1049 = vmatprep.subr.mxu0 %v1425_v39 }
 0x1bc   : > { %1050 = vmatpush3.msra.mxu0 %v483_v51 }
 0x1bd   : > { %1051 = vmatprep.subr.mxu0 %v1425_v39 }
 0x1be   : > { %1052 = vmatpush3.msra.mxu0 %v482_v52 }
 0x1bf   : > { %1053 = vmatprep.subr.mxu0 %v1425_v39 }
 0x1c0   : > { %1054 = vmatpush3.msra.mxu0 %v481_v53 }
 0x1c1   : > { %1055 = vmatprep.subr.mxu0 %v1425_v39 }
 0x1c2   : > { %1056 = vmatpush3.msra.mxu0 %v480_v54 }
 0x1c3   : > { %1058 = vmatmul.mubr.f32.vlgmr.msra.gmra.mxu0 %v479_v55  ;;  %1060 = vmatprep.subr.mxu0 %v1425_v39 }
 0x1c4   : > { %1061 = vmatpush3.xpose.msra.mxu0 %v477_v56  ;;  %1062 = vmatprep.mubr.msk.f32.mxu0 %vm1426_vm0, %v1425_v39 }
 0x283   : > { %v562_v58 = vpop.f32.mrf.mxu0 }
 0x284   : > { %v567_v59 = vmul.f32 %v566_v57, %v562_v58 }
 0x285   : > { %v1059_v60 = vpop.f32.mrf.mxu0 }
 0x286   : > { %1063 = vmatmul.mubr.f32.vlgmr.msra.gmra.mxu0 %v567_v59 }
 0x346   : > { %v634_v61 = vpop.f32.mrf.mxu0 }
 0x347   : > { %639 = vst.msk [vmem:[%s1647_s16] sm:$0xff] %vm638_vm1, %v634_v61  ;;  %v640_v62 = vsel %vm638_vm1, %v634_v61, -inf }
 0x348   : > { %641 = vmax.xlane.f32.xlu0 %v640_v62  ;;  %v1064_v63 = vpop.f32.mrf.mxu0 }
 0x3d1   : > { %v642_v0 = vpop.xlane.xlu0 %641 }
 0x3d2   : > { %v643_v1 = vsub.f32 %v634_v61, %v642_v0 }
 0x3d4   : > { %v644_v2 = vmul.f32 1.442695, %v643_v1 }
 0x3d6   : > { %1204 = vpow2.f32 %v644_v2 }
 0x3e3   : > { %v1205_v3 = vpop.eup %1204 }
 0x3e4   : > { %v646_v4 = vsel %vm638_vm1, %v1205_v3, 0.0 }
 0x3e5   : > { %647 = vadd.xlane.f32.xlu0 %v646_v4 }
 0x46e   : > { %v648_v6 = vpop.xlane.xlu0 %647 }
 0x46f   : > { %1206 = vrcp.f32 %v648_v6 }
 0x47c   : > { %v1207_v7 = vpop.eup %1206 }
 0x47d   : > { %v650_v8 = vmul.f32 %v1207_v7, %v1205_v3 }
 0x47f   : > { %1068 = vmatmul.mubr.msk.f32.vlgmr.msra.gmra.mxu1 %vm638_vm1, %v650_v8 }
 0x480   : > { %1071 = vmatpush3.msra.mxu1 %v739_v9  ;;  %1102 = vmatprep.mubr.msk.f32.mxu1 %vm1426_vm0, %v1425_v39 }
 0x481   : > { %1072 = vmatprep.subr.mxu1 %v1425_v39 }
 0x482   : > { %1073 = vmatpush3.msra.mxu1 %v738_v10 }
 0x483   : > { %1074 = vmatprep.subr.mxu1 %v1425_v39 }
 0x484   : > { %1075 = vmatpush3.msra.mxu1 %v737_v11 }
 0x485   : > { %1076 = vmatprep.subr.mxu1 %v1425_v39 }
 0x486   : > { %1077 = vmatpush3.msra.mxu1 %v736_v12 }
 0x487   : > { %1078 = vmatprep.subr.mxu1 %v1425_v39 }
 0x488   : > { %1079 = vmatpush3.msra.mxu1 %v735_v13 }
 0x489   : > { %1080 = vmatprep.subr.mxu1 %v1425_v39 }
 0x48a   : > { %1081 = vmatpush3.msra.mxu1 %v734_v14 }
 0x48b   : > { %1082 = vmatprep.subr.mxu1 %v1425_v39 }
 0x48c   : > { %1083 = vmatpush3.msra.mxu1 %v733_v15 }
 0x48d   : > { %1084 = vmatprep.subr.mxu1 %v1425_v39 }
 0x48e   : > { %1085 = vmatpush3.msra.mxu1 %v732_v16 }
 0x48f   : > { %1086 = vmatprep.subr.mxu1 %v1425_v39 }
 0x490   : > { %1087 = vmatpush3.msra.mxu1 %v731_v17 }
 0x491   : > { %1088 = vmatprep.subr.mxu1 %v1425_v39 }
 0x492   : > { %1089 = vmatpush3.msra.mxu1 %v730_v18 }
 0x493   : > { %1090 = vmatprep.subr.mxu1 %v1425_v39 }
 0x494   : > { %1091 = vmatpush3.msra.mxu1 %v729_v19 }
 0x495   : > { %1092 = vmatprep.subr.mxu1 %v1425_v39 }
 0x496   : > { %1093 = vmatpush3.msra.mxu1 %v728_v20 }
 0x497   : > { %1094 = vmatprep.subr.mxu1 %v1425_v39 }
 0x498   : > { %1095 = vmatpush3.msra.mxu1 %v727_v21 }
 0x499   : > { %1096 = vmatprep.subr.mxu1 %v1425_v39 }
 0x49a   : > { %1097 = vmatpush3.msra.mxu1 %v726_v22 }
 0x49b   : > { %1098 = vmatprep.subr.mxu1 %v1425_v39 }
 0x49c   : > { %1099 = vmatpush3.msra.mxu1 %v725_v23 }
 0x49d   : > { %1100 = vmatprep.subr.mxu1 %v1425_v39 }
 0x49e   : > { %1101 = vmatpush3.msra.mxu1 %v724_v24 }
 0x53f   : > { %v720_v25 = vpop.f32.mrf.mxu1 }
 0x540   : > { %1103 = vmatmul.mubr.f32.vlgmr.msra.gmra.mxu1 %v720_v25 }
 0x541   : > { %v1069_v26 = vpop.f32.mrf.mxu1 }
 0x600   : > { %v806_v27 = vpop.f32.mrf.mxu1 }
 0x601   : > { %810 = vst [vmem:[%s1651_s20] sm:$0xff] %v806_v27 }
 0x602   : > { %v1104_v28 = vpop.f32.mrf.mxu1 }
 0x603   : > { %1353 = shalt.err (!%p1350_p1)
}
 0x604   : > { %s1354_s15 = scalar_lea.hbm %s1709_s30, 128  ;;  %s1358_s14 = scalar_lea.hbm %s1760_s7, 256 }
 0x605   : > { %p1355_p3 = scmp.ne.s32.totalorder %s1709_s30, %s1354_s15  ;;  %p1359_p11 = scmp.lt.s32.totalorder %s1709_s30, %s1760_s7 }
 0x606   : > { %p1360_p8 = scmp.lt.s32.totalorder %s1358_s14, %s1354_s15 }
 0x607   : > { %p1356_p4 = pnand %p1355_p3, %p1781_p10 }
 0x608   : > { %p1361_p13 = por %p1360_p8, %p1359_p11 }
 0x609   : > { %p1357_p7 = pneg %p1356_p4 }
 0x60b   : > { %p1362_p2 = pnand %p1361_p13, %p1357_p7 }
 0x60d   : > { %1365 = shalt.err (!%p1362_p2)
}
 0x60e   : > { %1125 = dma.vmem_to_hbm [thread:$0]  (%p1781_p10), %s1711_s13, 128, %s1709_s30, %s816_s2  }
 0x60f PF: > { %s851_s20 = sand.u32 1, %s1400_s26   ;;  %p1782_p6 = scmp.ne.s32.totalorder %s1772_s24, 0 }
 0x610   : > { %p1783_p12 = scmp.ge.s32.totalorder %s1412_s29, 2  ;;  %s852_s22 = scalar_lea.sflag [#allocation6], %s851_s20 }
 0x612   : > { %p1145_p0 = pnand %p1783_p12, %p1782_p6 }
 0x614   : > { %p1146_p9 = pneg %p1145_p0 }
 0x616   : > { %1395 = dma.done.wait (%p1146_p9), %s852_s22, 128  }
 0x617   : > { %1397 = vsyncadd (%p1146_p9), %s852_s22, 4294967168  ;;  %p24_p5 = scmp.ge.s32.totalorder %s1561_s12, 4   ;;  %s1784_s26 = smov %s1404_s27 }
 0x618   : > { %s1785_s27 = smov %s1408_s28  ;;  %s1786_s28 = smov %s1572_s19 }
 0x619   : > { %s1787_s29 = smov %s1561_s12  ;;  %26 = sbr.rel (!%p24_p5) target bundleno = 10 (0xa), region = 121 }
 0x61e   :  { %857 = vsyncpa [#allocation5], 1 }
 0x61f   :  { %859 = vsyncpa [#allocation5 + $0x1], 1 }
 0x620   :  { %860 = vsyncpa [#allocation8], 1 }
 0x621   :  { %861 = vsyncpa [#allocation11], 1 }
 0x622   :  { %862 = vsyncpa [#allocation6], 1 }
 0x623   :  { %864 = vsyncpa [#allocation6 + $0x1], 1 }

</bundles_post_ra>
